<compile_context>
chip_gen: v7x
topology: tpu7x:2x2x1
jax: 0.10.0
libtpu: 0.0.40
codegen_flags: <defaults>
</compile_context>

<pallas_src>
import math

import jax
import jax.numpy as jnp
from jax.experimental import pallas as pl
from jax.experimental.pallas import tpu as pltpu

# ----------------------------- configuration -------------------------------
B = 2            # batch
S = 8            # sequence_length
D = 32           # d_model
NHEAD = 4
HEAD_DIM = D // NHEAD
DFF = 64         # dim_feedforward
BIAS = True
LN_EPS = 1e-5

BS = B * S

# packed-weight-slab layout (lane offsets are multiples of 128 -> vreg aligned)
WO_OFF = 128
W1_OFF = 256
SLAB_LANES = 384
LOWER_ROWS = max(2 * D, DFF)          # rows used by the "2D/DFF input" weights
SLAB_ROWS = D + LOWER_ROWS            # 32 + 64 = 96


# ------------------------------- kernel ------------------------------------
def _block_kernel(xo_ref, add0_ref, w_ref, rows_ref, out_ref):
    f32 = jnp.float32
    dn_tt = (((1,), (1,)), ((), ()))   # contract last dims == q @ k^T on MXU

    # ---- static slices of the packed weight slab (vreg-aligned offsets) ----
    w_l   = w_ref[D:D + 2 * D, 0:D]                 # (2D, D)  col 0 is zero
    w_qkv = w_ref[0:D, 0:3 * D]                     # (D, 3D)
    w_o   = w_ref[0:D, WO_OFF:WO_OFF + D]           # (D, D)
    w_1   = w_ref[0:D, W1_OFF:W1_OFF + DFF]         # (D, DFF)
    w_2   = w_ref[D:D + DFF, WO_OFF:WO_OFF + D]     # (DFF, D)

    # ---- bias / LayerNorm rows (one (8,128) slab) ----
    b_qkv = rows_ref[0:1, 0:3 * D]
    b_o   = rows_ref[1:2, 0:D]
    ln1w  = rows_ref[2:3, 0:D]
    ln1b  = rows_ref[3:4, 0:D]
    b_1   = rows_ref[4:5, 0:DFF]
    b_2   = rows_ref[5:6, 0:D]
    ln2w  = rows_ref[6:7, 0:D]
    ln2b  = rows_ref[7:8, 0:D]

    # ---- linear(cat(xs, obs)) + positional channel (baked into add0) ----
    # add0: column 0 = positions, columns 1.. = linear bias.
    y = jnp.dot(xo_ref[...], w_l, preferred_element_type=f32) + add0_ref[...]   # (BS, D)

    # ---- fused QKV projection ----
    qkv = jnp.dot(y, w_qkv, preferred_element_type=f32) + b_qkv                 # (BS, 3D)

    # ---- attention scores for every (batch, head), one softmax pass ----
    scale = 1.0 / math.sqrt(HEAD_DIM)
    scores = []
    for b in range(B):                       # static unroll (B*NHEAD = 8 tiles)
        r = b * S
        for h in range(NHEAD):
            lo = h * HEAD_DIM
            qh = qkv[r:r + S, lo:lo + HEAD_DIM] * scale
            kh = qkv[r:r + S, D + lo:D + lo + HEAD_DIM]
            scores.append(jax.lax.dot_general(qh, kh, dn_tt,
                                              preferred_element_type=f32))
    s_all = jnp.concatenate(scores, axis=0)                    # (B*NHEAD*S, S)
    s_all = s_all - jnp.max(s_all, axis=-1, keepdims=True)
    p_all = jnp.exp(s_all)
    p_all = p_all * pl.reciprocal(jnp.sum(p_all, axis=-1, keepdims=True),
                                  approx=True)

    # ---- context + out-projection accumulated per head (no lane concat) ----
    attn_rows = []
    for b in range(B):
        r = b * S
        acc = jnp.zeros((S, D), f32)
        for h in range(NHEAD):
            lo = h * HEAD_DIM
            i = (b * NHEAD + h) * S
            p = p_all[i:i + S, :]                              # (S, S)
            vh = qkv[r:r + S, 2 * D + lo:2 * D + lo + HEAD_DIM]
            ctx_h = jnp.dot(p, vh, preferred_element_type=f32)  # (S, hd)
            acc = acc + jnp.dot(ctx_h, w_o[lo:lo + HEAD_DIM, :],
                                preferred_element_type=f32)
        attn_rows.append(acc)
    attn = jnp.concatenate(attn_rows, axis=0) + b_o            # (BS, D)

    # ---- residual + LayerNorm 1 ----
    x = y + attn
    mu = jnp.mean(x, axis=-1, keepdims=True)
    var = jnp.mean((x - mu) ** 2, axis=-1, keepdims=True)
    x = (x - mu) * jax.lax.rsqrt(var + LN_EPS) * ln1w + ln1b

    # ---- feed-forward (ReLU) ----
    h1 = jnp.maximum(jnp.dot(x, w_1, preferred_element_type=f32) + b_1, 0.0)
    ff = jnp.dot(h1, w_2, preferred_element_type=f32) + b_2

    # ---- residual + LayerNorm 2 ----
    x2 = x + ff
    mu2 = jnp.mean(x2, axis=-1, keepdims=True)
    var2 = jnp.mean((x2 - mu2) ** 2, axis=-1, keepdims=True)
    out = (x2 - mu2) * jax.lax.rsqrt(var2 + LN_EPS) * ln2w + ln2b

    out_ref[...] = out.astype(out_ref.dtype)


# ------------------------------- wrapper ------------------------------------
@jax.jit
def transformer_ts_mapping_block(xs, obs, w_slab, bias_rows, add0):
    # host-side (outside the kernel): fuse xs/obs and flatten batch onto rows
    xo = jnp.concatenate([xs, obs], axis=-1).reshape(BS, 2 * D)

    out2d = pl.pallas_call(
        _block_kernel,
        out_shape=jax.ShapeDtypeStruct((BS, D), jnp.float32),
        grid=(1,),
        in_specs=[
            pl.BlockSpec((BS, 2 * D), lambda i: (0, 0)),            # xo
            pl.BlockSpec((BS, D), lambda i: (0, 0)),                # add0
            pl.BlockSpec((SLAB_ROWS, SLAB_LANES), lambda i: (0, 0)),  # weights
            pl.BlockSpec((8, 128), lambda i: (0, 0)),               # bias rows
        ],
        out_specs=pl.BlockSpec((BS, D), lambda i: (0, 0)),
        compiler_params=pltpu.CompilerParams(
            dimension_semantics=("arbitrary",)),
    )(xo, add0, w_slab, bias_rows)

    return out2d.reshape(B, S, D)


# --------------------------- host-side packing -------------------------------
def pack_params(params, pos):
    (wlx, wlo, bl, wq, bq, wk, bk, wv, bv, wo, bo,
     ln1w, ln1b, w1, b1, w2, b2, ln2w, ln2b) = params

    # weight slab: upper band = D-input weights, lower band = 2D/DFF-input ones
    w_slab = jnp.zeros((SLAB_ROWS, SLAB_LANES), jnp.float32)
    wqkv = jnp.concatenate([wq, wk, wv], axis=1)                  # (D, 3D)
    w_slab = w_slab.at[0:D, 0:3 * D].set(wqkv)
    w_slab = w_slab.at[0:D, WO_OFF:WO_OFF + D].set(wo)
    w_slab = w_slab.at[0:D, W1_OFF:W1_OFF + DFF].set(w1)
    wl = jnp.concatenate([wlx, wlo], axis=0)                      # (2D, D-1)
    wl_pad = jnp.pad(wl, ((0, 0), (1, 0)))                        # (2D, D), col0=0
    w_slab = w_slab.at[D:D + 2 * D, 0:D].set(wl_pad)
    w_slab = w_slab.at[D:D + DFF, WO_OFF:WO_OFF + D].set(w2)

    # bias / LayerNorm rows packed into one (8, 128) vreg-shaped slab
    rows = jnp.zeros((8, 128), jnp.float32)
    rows = rows.at[0, 0:3 * D].set(jnp.concatenate([bq, bk, bv], axis=1)[0])
    rows = rows.at[1, 0:D].set(bo[0])
    rows = rows.at[2, 0:D].set(ln1w[0])
    rows = rows.at[3, 0:D].set(ln1b[0])
    rows = rows.at[4, 0:DFF].set(b1[0])
    rows = rows.at[5, 0:D].set(b2[0])
    rows = rows.at[6, 0:D].set(ln2w[0])
    rows = rows.at[7, 0:D].set(ln2b[0])

    # additive term replacing both concatenates: col0 = positions, col1.. = bl
    pos_col = jnp.broadcast_to(pos, (B, S, 1)).reshape(BS, 1)
    add0 = jnp.concatenate(
        [pos_col, jnp.broadcast_to(bl, (BS, D - 1))], axis=1)     # (BS, D)

    return w_slab, rows, add0


# ---------------------------- pure-JAX reference ----------------------------
def _layernorm(x, w, b):
    mu = jnp.mean(x, axis=-1, keepdims=True)
    var = jnp.mean((x - mu) ** 2, axis=-1, keepdims=True)
    return (x - mu) * jax.lax.rsqrt(var + LN_EPS) * w + b


def reference_forward(xs, obs, pos, params):
    (wlx, wlo, bl, wq, bq, wk, bk, wv, bv, wo, bo,
     ln1w, ln1b, w1, b1, w2, b2, ln2w, ln2b) = params
    y = xs @ wlx + obs @ wlo + bl                                  # (B,S,D-1)
    p_bcast = jnp.broadcast_to(pos, (xs.shape[0], S, 1))
    y = jnp.concatenate([p_bcast, y], axis=-1)                     # (B,S,D)

    q = y @ wq + bq
    k = y @ wk + bk
    v = y @ wv + bv
    qh = q.reshape(B, S, NHEAD, HEAD_DIM).transpose(0, 2, 1, 3)
    kh = k.reshape(B, S, NHEAD, HEAD_DIM).transpose(0, 2, 1, 3)
    vh = v.reshape(B, S, NHEAD, HEAD_DIM).transpose(0, 2, 1, 3)
    scores = jnp.einsum('bhqd,bhkd->bhqk', qh, kh) / math.sqrt(HEAD_DIM)
    attn = jax.nn.softmax(scores, axis=-1)
    ctx = jnp.einsum('bhqk,bhkd->bhqd', attn, vh)
    ctx = ctx.transpose(0, 2, 1, 3).reshape(B, S, D)
    attn_out = ctx @ wo + bo

    x = _layernorm(y + attn_out, ln1w, ln1b)
    ff = jax.nn.relu(x @ w1 + b1) @ w2 + b2
    return _layernorm(x + ff, ln2w, ln2b)


# ------------------------------ param init ----------------------------------
def make_params(key):
    ks = jax.random.split(key, 16)
    scale = 0.1
    # nn.Linear(2*D, D-1): split into xs / obs halves, pre-transposed (in,out)
    wlx = scale * jax.random.normal(ks[0], (D, D - 1), jnp.float32)
    wlo = scale * jax.random.normal(ks[1], (D, D - 1), jnp.float32)
    bl = (scale * jax.random.normal(ks[2], (1, D - 1), jnp.float32)
          if BIAS else jnp.zeros((1, D - 1), jnp.float32))
    # MultiheadAttention in-projection (q, k, v), pre-transposed (D, D)
    wq = scale * jax.random.normal(ks[3], (D, D), jnp.float32)
    wk = scale * jax.random.normal(ks[4], (D, D), jnp.float32)
    wv = scale * jax.random.normal(ks[5], (D, D), jnp.float32)
    bq = scale * jax.random.normal(ks[6], (1, D), jnp.float32)
    bk = scale * jax.random.normal(ks[7], (1, D), jnp.float32)
    bv = scale * jax.random.normal(ks[8], (1, D), jnp.float32)
    # out-projection
    wo = scale * jax.random.normal(ks[9], (D, D), jnp.float32)
    bo = scale * jax.random.normal(ks[10], (1, D), jnp.float32)
    # LayerNorm 1
    ln1w = jnp.ones((1, D), jnp.float32)
    ln1b = jnp.zeros((1, D), jnp.float32)
    # FFN
    w1 = scale * jax.random.normal(ks[11], (D, DFF), jnp.float32)
    b1 = scale * jax.random.normal(ks[12], (1, DFF), jnp.float32)
    w2 = scale * jax.random.normal(ks[13], (DFF, D), jnp.float32)
    b2 = scale * jax.random.normal(ks[14], (1, D), jnp.float32)
    # LayerNorm 2
    ln2w = jnp.ones((1, D), jnp.float32)
    ln2b = jnp.zeros((1, D), jnp.float32)
    return (wlx, wlo, bl, wq, bq, wk, bk, wv, bv, wo, bo,
            ln1w, ln1b, w1, b1, w2, b2, ln2w, ln2b)


# --------------------------------- main --------------------------------------
if __name__ == "__main__":
    key = jax.random.PRNGKey(0)
    k_xs, k_obs, k_par = jax.random.split(key, 3)

    xs = jax.random.normal(k_xs, (B, S, D), jnp.float32)
    obs = jax.random.normal(k_obs, (B, S, D), jnp.float32)
    # positions = linspace(0, 1, S)[None, :, None]
    pos = jnp.linspace(0.0, 1.0, S, dtype=jnp.float32)[None, :, None]
    params = make_params(k_par)

    # pack parameters once (outside the timed forward)
    w_slab, bias_rows, add0 = pack_params(params, pos)

    out = transformer_ts_mapping_block(xs, obs, w_slab, bias_rows, add0)
    out = jax.block_until_ready(out)

    ref = reference_forward(xs, obs, pos, params)
    assert out.shape == (B, S, D), out.shape
    # tolerance slightly relaxed vs exact softmax because of the approximate
    # EUP reciprocal in the softmax denominator; real bugs would be >> 1e-2.
    max_err = float(jnp.max(jnp.abs(out - ref)))
    assert max_err < 2e-3, max_err

    print("KERNEL_OK")
</pallas_src>

<mosaic_0001>
module attributes {stable_mosaic.version = 11 : i64} {
  func.func @_block_kernel(%arg0: i32, %arg1: memref<16x64xf32, #tpu.memory_space<vmem>>, %arg2: memref<16x32xf32, #tpu.memory_space<vmem>>, %arg3: memref<96x384xf32, #tpu.memory_space<vmem>>, %arg4: memref<8x128xf32, #tpu.memory_space<vmem>>, %arg5: memref<16x32xf32, #tpu.memory_space<vmem>>) attributes {dimension_semantics = [#tpu.dimension_semantics<arbitrary>], iteration_bounds = array<i64: 1>, scalar_prefetch = 0 : i64, scratch_operands = 0 : i64, tpu.core_type = #tpu.core_type<tc>, window_params = [{pipeline_mode = #tpu.pipeline_mode<synchronous>, transform_indices = @transform_0, window_bounds = array<i64: 16, 64>}, {pipeline_mode = #tpu.pipeline_mode<synchronous>, transform_indices = @transform_1, window_bounds = array<i64: 16, 32>}, {pipeline_mode = #tpu.pipeline_mode<synchronous>, transform_indices = @transform_2, window_bounds = array<i64: 96, 384>}, {pipeline_mode = #tpu.pipeline_mode<synchronous>, transform_indices = @transform_3, window_bounds = array<i64: 8, 128>}, {pipeline_mode = #tpu.pipeline_mode<synchronous>, transform_indices = @transform_4, window_bounds = array<i64: 16, 32>}]} {
    %c32 = arith.constant 32 : index
    %c0 = arith.constant 0 : index
    %0 = vector.load %arg3[%c32, %c0] : memref<96x384xf32, #tpu.memory_space<vmem>>, vector<64x32xf32>
    %c0_0 = arith.constant 0 : index
    %c0_1 = arith.constant 0 : index
    %1 = vector.load %arg3[%c0_0, %c0_1] : memref<96x384xf32, #tpu.memory_space<vmem>>, vector<32x96xf32>
    %c0_2 = arith.constant 0 : index
    %c128 = arith.constant 128 : index
    %2 = vector.load %arg3[%c0_2, %c128] : memref<96x384xf32, #tpu.memory_space<vmem>>, vector<32x32xf32>
    %c0_3 = arith.constant 0 : index
    %c256 = arith.constant 256 : index
    %3 = vector.load %arg3[%c0_3, %c256] : memref<96x384xf32, #tpu.memory_space<vmem>>, vector<32x64xf32>
    %c32_4 = arith.constant 32 : index
    %c128_5 = arith.constant 128 : index
    %4 = vector.load %arg3[%c32_4, %c128_5] : memref<96x384xf32, #tpu.memory_space<vmem>>, vector<64x32xf32>
    %c0_6 = arith.constant 0 : index
    %c0_7 = arith.constant 0 : index
    %5 = vector.load %arg4[%c0_6, %c0_7] : memref<8x128xf32, #tpu.memory_space<vmem>>, vector<1x96xf32>
    %c1 = arith.constant 1 : index
    %c0_8 = arith.constant 0 : index
    %6 = vector.load %arg4[%c1, %c0_8] : memref<8x128xf32, #tpu.memory_space<vmem>>, vector<1x32xf32>
    %c2 = arith.constant 2 : index
    %c0_9 = arith.constant 0 : index
    %7 = vector.load %arg4[%c2, %c0_9] : memref<8x128xf32, #tpu.memory_space<vmem>>, vector<1x32xf32>
    %c3 = arith.constant 3 : index
    %c0_10 = arith.constant 0 : index
    %8 = vector.load %arg4[%c3, %c0_10] : memref<8x128xf32, #tpu.memory_space<vmem>>, vector<1x32xf32>
    %c4 = arith.constant 4 : index
    %c0_11 = arith.constant 0 : index
    %9 = vector.load %arg4[%c4, %c0_11] : memref<8x128xf32, #tpu.memory_space<vmem>>, vector<1x64xf32>
    %c5 = arith.constant 5 : index
    %c0_12 = arith.constant 0 : index
    %10 = vector.load %arg4[%c5, %c0_12] : memref<8x128xf32, #tpu.memory_space<vmem>>, vector<1x32xf32>
    %c6 = arith.constant 6 : index
    %c0_13 = arith.constant 0 : index
    %11 = vector.load %arg4[%c6, %c0_13] : memref<8x128xf32, #tpu.memory_space<vmem>>, vector<1x32xf32>
    %c7 = arith.constant 7 : index
    %c0_14 = arith.constant 0 : index
    %12 = vector.load %arg4[%c7, %c0_14] : memref<8x128xf32, #tpu.memory_space<vmem>>, vector<1x32xf32>
    %c0_15 = arith.constant 0 : index
    %c0_16 = arith.constant 0 : index
    %13 = vector.load %arg1[%c0_15, %c0_16] : memref<16x64xf32, #tpu.memory_space<vmem>>, vector<16x64xf32>
    %cst = arith.constant dense<0.000000e+00> : vector<16x32xf32>
    %14 = tpu.matmul %13, %0, %cst {dimension_numbers = #tpu.dot_dimension_numbers<[1], [0], [0], [1], [0, 0, 1, 1], [], []>} : vector<16x64xf32>, vector<64x32xf32>, vector<16x32xf32> -> vector<16x32xf32>
    %c0_17 = arith.constant 0 : index
    %c0_18 = arith.constant 0 : index
    %15 = vector.load %arg2[%c0_17, %c0_18] : memref<16x32xf32, #tpu.memory_space<vmem>>, vector<16x32xf32>
    %16 = arith.addf %14, %15 : vector<16x32xf32>
    %cst_19 = arith.constant dense<0.000000e+00> : vector<16x96xf32>
    %17 = tpu.matmul %16, %1, %cst_19 {dimension_numbers = #tpu.dot_dimension_numbers<[1], [0], [0], [1], [0, 0, 1, 1], [], []>} : vector<16x32xf32>, vector<32x96xf32>, vector<16x96xf32> -> vector<16x96xf32>
    %18 = vector.broadcast %5 : vector<1x96xf32> to vector<16x96xf32>
    %19 = arith.addf %17, %18 : vector<16x96xf32>
    %20 = vector.extract_strided_slice %19 {offsets = [0, 0], sizes = [8, 8], strides = [1, 1]} : vector<16x96xf32> to vector<8x8xf32>
    %cst_20 = arith.constant 0.353553385 : f32
    %21 = vector.broadcast %cst_20 : f32 to vector<8x8xf32>
    %22 = arith.mulf %20, %21 : vector<8x8xf32>
    %23 = vector.extract_strided_slice %19 {offsets = [0, 32], sizes = [8, 8], strides = [1, 1]} : vector<16x96xf32> to vector<8x8xf32>
    %cst_21 = arith.constant dense<0.000000e+00> : vector<8x8xf32>
    %24 = tpu.matmul %22, %23, %cst_21 {dimension_numbers = #tpu.dot_dimension_numbers<[1], [1], [0], [0], [0, 0, 1, 0], [], []>} : vector<8x8xf32>, vector<8x8xf32>, vector<8x8xf32> -> vector<8x8xf32>
    %25 = vector.extract_strided_slice %19 {offsets = [0, 8], sizes = [8, 8], strides = [1, 1]} : vector<16x96xf32> to vector<8x8xf32>
    %cst_22 = arith.constant 0.353553385 : f32
    %26 = vector.broadcast %cst_22 : f32 to vector<8x8xf32>
    %27 = arith.mulf %25, %26 : vector<8x8xf32>
    %28 = vector.extract_strided_slice %19 {offsets = [0, 40], sizes = [8, 8], strides = [1, 1]} : vector<16x96xf32> to vector<8x8xf32>
    %cst_23 = arith.constant dense<0.000000e+00> : vector<8x8xf32>
    %29 = tpu.matmul %27, %28, %cst_23 {dimension_numbers = #tpu.dot_dimension_numbers<[1], [1], [0], [0], [0, 0, 1, 0], [], []>} : vector<8x8xf32>, vector<8x8xf32>, vector<8x8xf32> -> vector<8x8xf32>
    %30 = vector.extract_strided_slice %19 {offsets = [0, 16], sizes = [8, 8], strides = [1, 1]} : vector<16x96xf32> to vector<8x8xf32>
    %cst_24 = arith.constant 0.353553385 : f32
    %31 = vector.broadcast %cst_24 : f32 to vector<8x8xf32>
    %32 = arith.mulf %30, %31 : vector<8x8xf32>
    %33 = vector.extract_strided_slice %19 {offsets = [0, 48], sizes = [8, 8], strides = [1, 1]} : vector<16x96xf32> to vector<8x8xf32>
    %cst_25 = arith.constant dense<0.000000e+00> : vector<8x8xf32>
    %34 = tpu.matmul %32, %33, %cst_25 {dimension_numbers = #tpu.dot_dimension_numbers<[1], [1], [0], [0], [0, 0, 1, 0], [], []>} : vector<8x8xf32>, vector<8x8xf32>, vector<8x8xf32> -> vector<8x8xf32>
    %35 = vector.extract_strided_slice %19 {offsets = [0, 24], sizes = [8, 8], strides = [1, 1]} : vector<16x96xf32> to vector<8x8xf32>
    %cst_26 = arith.constant 0.353553385 : f32
    %36 = vector.broadcast %cst_26 : f32 to vector<8x8xf32>
    %37 = arith.mulf %35, %36 : vector<8x8xf32>
    %38 = vector.extract_strided_slice %19 {offsets = [0, 56], sizes = [8, 8], strides = [1, 1]} : vector<16x96xf32> to vector<8x8xf32>
    %cst_27 = arith.constant dense<0.000000e+00> : vector<8x8xf32>
    %39 = tpu.matmul %37, %38, %cst_27 {dimension_numbers = #tpu.dot_dimension_numbers<[1], [1], [0], [0], [0, 0, 1, 0], [], []>} : vector<8x8xf32>, vector<8x8xf32>, vector<8x8xf32> -> vector<8x8xf32>
    %40 = vector.extract_strided_slice %19 {offsets = [8, 0], sizes = [8, 8], strides = [1, 1]} : vector<16x96xf32> to vector<8x8xf32>
    %cst_28 = arith.constant 0.353553385 : f32
    %41 = vector.broadcast %cst_28 : f32 to vector<8x8xf32>
    %42 = arith.mulf %40, %41 : vector<8x8xf32>
    %43 = vector.extract_strided_slice %19 {offsets = [8, 32], sizes = [8, 8], strides = [1, 1]} : vector<16x96xf32> to vector<8x8xf32>
    %cst_29 = arith.constant dense<0.000000e+00> : vector<8x8xf32>
    %44 = tpu.matmul %42, %43, %cst_29 {dimension_numbers = #tpu.dot_dimension_numbers<[1], [1], [0], [0], [0, 0, 1, 0], [], []>} : vector<8x8xf32>, vector<8x8xf32>, vector<8x8xf32> -> vector<8x8xf32>
    %45 = vector.extract_strided_slice %19 {offsets = [8, 8], sizes = [8, 8], strides = [1, 1]} : vector<16x96xf32> to vector<8x8xf32>
    %cst_30 = arith.constant 0.353553385 : f32
    %46 = vector.broadcast %cst_30 : f32 to vector<8x8xf32>
    %47 = arith.mulf %45, %46 : vector<8x8xf32>
    %48 = vector.extract_strided_slice %19 {offsets = [8, 40], sizes = [8, 8], strides = [1, 1]} : vector<16x96xf32> to vector<8x8xf32>
    %cst_31 = arith.constant dense<0.000000e+00> : vector<8x8xf32>
    %49 = tpu.matmul %47, %48, %cst_31 {dimension_numbers = #tpu.dot_dimension_numbers<[1], [1], [0], [0], [0, 0, 1, 0], [], []>} : vector<8x8xf32>, vector<8x8xf32>, vector<8x8xf32> -> vector<8x8xf32>
    %50 = vector.extract_strided_slice %19 {offsets = [8, 16], sizes = [8, 8], strides = [1, 1]} : vector<16x96xf32> to vector<8x8xf32>
    %cst_32 = arith.constant 0.353553385 : f32
    %51 = vector.broadcast %cst_32 : f32 to vector<8x8xf32>
    %52 = arith.mulf %50, %51 : vector<8x8xf32>
    %53 = vector.extract_strided_slice %19 {offsets = [8, 48], sizes = [8, 8], strides = [1, 1]} : vector<16x96xf32> to vector<8x8xf32>
    %cst_33 = arith.constant dense<0.000000e+00> : vector<8x8xf32>
    %54 = tpu.matmul %52, %53, %cst_33 {dimension_numbers = #tpu.dot_dimension_numbers<[1], [1], [0], [0], [0, 0, 1, 0], [], []>} : vector<8x8xf32>, vector<8x8xf32>, vector<8x8xf32> -> vector<8x8xf32>
    %55 = vector.extract_strided_slice %19 {offsets = [8, 24], sizes = [8, 8], strides = [1, 1]} : vector<16x96xf32> to vector<8x8xf32>
    %cst_34 = arith.constant 0.353553385 : f32
    %56 = vector.broadcast %cst_34 : f32 to vector<8x8xf32>
    %57 = arith.mulf %55, %56 : vector<8x8xf32>
    %58 = vector.extract_strided_slice %19 {offsets = [8, 56], sizes = [8, 8], strides = [1, 1]} : vector<16x96xf32> to vector<8x8xf32>
    %cst_35 = arith.constant dense<0.000000e+00> : vector<8x8xf32>
    %59 = tpu.matmul %57, %58, %cst_35 {dimension_numbers = #tpu.dot_dimension_numbers<[1], [1], [0], [0], [0, 0, 1, 0], [], []>} : vector<8x8xf32>, vector<8x8xf32>, vector<8x8xf32> -> vector<8x8xf32>
    %60 = tpu.concatenate %24, %29, %34, %39, %44, %49, %54, %59 in 0 : vector<8x8xf32>, vector<8x8xf32>, vector<8x8xf32>, vector<8x8xf32>, vector<8x8xf32>, vector<8x8xf32>, vector<8x8xf32>, vector<8x8xf32> -> vector<64x8xf32>
    %cst_36 = arith.constant dense<0xFF800000> : vector<64xf32>
    %61 = vector.multi_reduction <maximumf>, %60, %cst_36 [1] : vector<64x8xf32> to vector<64xf32>
    %62 = vector.shape_cast %61 : vector<64xf32> to vector<64x1xf32>
    %63 = vector.broadcast %62 : vector<64x1xf32> to vector<64x8xf32>
    %64 = arith.subf %60, %63 : vector<64x8xf32>
    %65 = math.exp %64 : vector<64x8xf32>
    %cst_37 = arith.constant dense<0.000000e+00> : vector<64xf32>
    %66 = vector.multi_reduction <add>, %65, %cst_37 [1] : vector<64x8xf32> to vector<64xf32>
    %67 = vector.shape_cast %66 : vector<64xf32> to vector<64x1xf32>
    %68 = tpu.reciprocal %67 {approx = true} : vector<64x1xf32> -> vector<64x1xf32>
    %69 = vector.broadcast %68 : vector<64x1xf32> to vector<64x8xf32>
    %70 = arith.mulf %65, %69 : vector<64x8xf32>
    %cst_38 = arith.constant 0.000000e+00 : f32
    %71 = vector.broadcast %cst_38 : f32 to vector<8x32xf32>
    %72 = vector.extract_strided_slice %70 {offsets = [0, 0], sizes = [8, 8], strides = [1, 1]} : vector<64x8xf32> to vector<8x8xf32>
    %73 = vector.extract_strided_slice %19 {offsets = [0, 64], sizes = [8, 8], strides = [1, 1]} : vector<16x96xf32> to vector<8x8xf32>
    %cst_39 = arith.constant dense<0.000000e+00> : vector<8x8xf32>
    %74 = tpu.matmul %72, %73, %cst_39 {dimension_numbers = #tpu.dot_dimension_numbers<[1], [0], [0], [1], [0, 0, 1, 1], [], []>} : vector<8x8xf32>, vector<8x8xf32>, vector<8x8xf32> -> vector<8x8xf32>
    %75 = vector.extract_strided_slice %2 {offsets = [0, 0], sizes = [8, 32], strides = [1, 1]} : vector<32x32xf32> to vector<8x32xf32>
    %cst_40 = arith.constant dense<0.000000e+00> : vector<8x32xf32>
    %76 = tpu.matmul %74, %75, %cst_40 {dimension_numbers = #tpu.dot_dimension_numbers<[1], [0], [0], [1], [0, 0, 1, 1], [], []>} : vector<8x8xf32>, vector<8x32xf32>, vector<8x32xf32> -> vector<8x32xf32>
    %77 = arith.addf %71, %76 : vector<8x32xf32>
    %78 = vector.extract_strided_slice %70 {offsets = [8, 0], sizes = [8, 8], strides = [1, 1]} : vector<64x8xf32> to vector<8x8xf32>
    %79 = vector.extract_strided_slice %19 {offsets = [0, 72], sizes = [8, 8], strides = [1, 1]} : vector<16x96xf32> to vector<8x8xf32>
    %cst_41 = arith.constant dense<0.000000e+00> : vector<8x8xf32>
    %80 = tpu.matmul %78, %79, %cst_41 {dimension_numbers = #tpu.dot_dimension_numbers<[1], [0], [0], [1], [0, 0, 1, 1], [], []>} : vector<8x8xf32>, vector<8x8xf32>, vector<8x8xf32> -> vector<8x8xf32>
    %81 = vector.extract_strided_slice %2 {offsets = [8, 0], sizes = [8, 32], strides = [1, 1]} : vector<32x32xf32> to vector<8x32xf32>
    %cst_42 = arith.constant dense<0.000000e+00> : vector<8x32xf32>
    %82 = tpu.matmul %80, %81, %cst_42 {dimension_numbers = #tpu.dot_dimension_numbers<[1], [0], [0], [1], [0, 0, 1, 1], [], []>} : vector<8x8xf32>, vector<8x32xf32>, vector<8x32xf32> -> vector<8x32xf32>
    %83 = arith.addf %77, %82 : vector<8x32xf32>
    %84 = vector.extract_strided_slice %70 {offsets = [16, 0], sizes = [8, 8], strides = [1, 1]} : vector<64x8xf32> to vector<8x8xf32>
    %85 = vector.extract_strided_slice %19 {offsets = [0, 80], sizes = [8, 8], strides = [1, 1]} : vector<16x96xf32> to vector<8x8xf32>
    %cst_43 = arith.constant dense<0.000000e+00> : vector<8x8xf32>
    %86 = tpu.matmul %84, %85, %cst_43 {dimension_numbers = #tpu.dot_dimension_numbers<[1], [0], [0], [1], [0, 0, 1, 1], [], []>} : vector<8x8xf32>, vector<8x8xf32>, vector<8x8xf32> -> vector<8x8xf32>
    %87 = vector.extract_strided_slice %2 {offsets = [16, 0], sizes = [8, 32], strides = [1, 1]} : vector<32x32xf32> to vector<8x32xf32>
    %cst_44 = arith.constant dense<0.000000e+00> : vector<8x32xf32>
    %88 = tpu.matmul %86, %87, %cst_44 {dimension_numbers = #tpu.dot_dimension_numbers<[1], [0], [0], [1], [0, 0, 1, 1], [], []>} : vector<8x8xf32>, vector<8x32xf32>, vector<8x32xf32> -> vector<8x32xf32>
    %89 = arith.addf %83, %88 : vector<8x32xf32>
    %90 = vector.extract_strided_slice %70 {offsets = [24, 0], sizes = [8, 8], strides = [1, 1]} : vector<64x8xf32> to vector<8x8xf32>
    %91 = vector.extract_strided_slice %19 {offsets = [0, 88], sizes = [8, 8], strides = [1, 1]} : vector<16x96xf32> to vector<8x8xf32>
    %cst_45 = arith.constant dense<0.000000e+00> : vector<8x8xf32>
    %92 = tpu.matmul %90, %91, %cst_45 {dimension_numbers = #tpu.dot_dimension_numbers<[1], [0], [0], [1], [0, 0, 1, 1], [], []>} : vector<8x8xf32>, vector<8x8xf32>, vector<8x8xf32> -> vector<8x8xf32>
    %93 = vector.extract_strided_slice %2 {offsets = [24, 0], sizes = [8, 32], strides = [1, 1]} : vector<32x32xf32> to vector<8x32xf32>
    %cst_46 = arith.constant dense<0.000000e+00> : vector<8x32xf32>
    %94 = tpu.matmul %92, %93, %cst_46 {dimension_numbers = #tpu.dot_dimension_numbers<[1], [0], [0], [1], [0, 0, 1, 1], [], []>} : vector<8x8xf32>, vector<8x32xf32>, vector<8x32xf32> -> vector<8x32xf32>
    %95 = arith.addf %89, %94 : vector<8x32xf32>
    %cst_47 = arith.constant 0.000000e+00 : f32
    %96 = vector.broadcast %cst_47 : f32 to vector<8x32xf32>
    %97 = vector.extract_strided_slice %70 {offsets = [32, 0], sizes = [8, 8], strides = [1, 1]} : vector<64x8xf32> to vector<8x8xf32>
    %98 = vector.extract_strided_slice %19 {offsets = [8, 64], sizes = [8, 8], strides = [1, 1]} : vector<16x96xf32> to vector<8x8xf32>
    %cst_48 = arith.constant dense<0.000000e+00> : vector<8x8xf32>
    %99 = tpu.matmul %97, %98, %cst_48 {dimension_numbers = #tpu.dot_dimension_numbers<[1], [0], [0], [1], [0, 0, 1, 1], [], []>} : vector<8x8xf32>, vector<8x8xf32>, vector<8x8xf32> -> vector<8x8xf32>
    %100 = vector.extract_strided_slice %2 {offsets = [0, 0], sizes = [8, 32], strides = [1, 1]} : vector<32x32xf32> to vector<8x32xf32>
    %cst_49 = arith.constant dense<0.000000e+00> : vector<8x32xf32>
    %101 = tpu.matmul %99, %100, %cst_49 {dimension_numbers = #tpu.dot_dimension_numbers<[1], [0], [0], [1], [0, 0, 1, 1], [], []>} : vector<8x8xf32>, vector<8x32xf32>, vector<8x32xf32> -> vector<8x32xf32>
    %102 = arith.addf %96, %101 : vector<8x32xf32>
    %103 = vector.extract_strided_slice %70 {offsets = [40, 0], sizes = [8, 8], strides = [1, 1]} : vector<64x8xf32> to vector<8x8xf32>
    %104 = vector.extract_strided_slice %19 {offsets = [8, 72], sizes = [8, 8], strides = [1, 1]} : vector<16x96xf32> to vector<8x8xf32>
    %cst_50 = arith.constant dense<0.000000e+00> : vector<8x8xf32>
    %105 = tpu.matmul %103, %104, %cst_50 {dimension_numbers = #tpu.dot_dimension_numbers<[1], [0], [0], [1], [0, 0, 1, 1], [], []>} : vector<8x8xf32>, vector<8x8xf32>, vector<8x8xf32> -> vector<8x8xf32>
    %106 = vector.extract_strided_slice %2 {offsets = [8, 0], sizes = [8, 32], strides = [1, 1]} : vector<32x32xf32> to vector<8x32xf32>
    %cst_51 = arith.constant dense<0.000000e+00> : vector<8x32xf32>
    %107 = tpu.matmul %105, %106, %cst_51 {dimension_numbers = #tpu.dot_dimension_numbers<[1], [0], [0], [1], [0, 0, 1, 1], [], []>} : vector<8x8xf32>, vector<8x32xf32>, vector<8x32xf32> -> vector<8x32xf32>
    %108 = arith.addf %102, %107 : vector<8x32xf32>
    %109 = vector.extract_strided_slice %70 {offsets = [48, 0], sizes = [8, 8], strides = [1, 1]} : vector<64x8xf32> to vector<8x8xf32>
    %110 = vector.extract_strided_slice %19 {offsets = [8, 80], sizes = [8, 8], strides = [1, 1]} : vector<16x96xf32> to vector<8x8xf32>
    %cst_52 = arith.constant dense<0.000000e+00> : vector<8x8xf32>
    %111 = tpu.matmul %109, %110, %cst_52 {dimension_numbers = #tpu.dot_dimension_numbers<[1], [0], [0], [1], [0, 0, 1, 1], [], []>} : vector<8x8xf32>, vector<8x8xf32>, vector<8x8xf32> -> vector<8x8xf32>
    %112 = vector.extract_strided_slice %2 {offsets = [16, 0], sizes = [8, 32], strides = [1, 1]} : vector<32x32xf32> to vector<8x32xf32>
    %cst_53 = arith.constant dense<0.000000e+00> : vector<8x32xf32>
    %113 = tpu.matmul %111, %112, %cst_53 {dimension_numbers = #tpu.dot_dimension_numbers<[1], [0], [0], [1], [0, 0, 1, 1], [], []>} : vector<8x8xf32>, vector<8x32xf32>, vector<8x32xf32> -> vector<8x32xf32>
    %114 = arith.addf %108, %113 : vector<8x32xf32>
    %115 = vector.extract_strided_slice %70 {offsets = [56, 0], sizes = [8, 8], strides = [1, 1]} : vector<64x8xf32> to vector<8x8xf32>
    %116 = vector.extract_strided_slice %19 {offsets = [8, 88], sizes = [8, 8], strides = [1, 1]} : vector<16x96xf32> to vector<8x8xf32>
    %cst_54 = arith.constant dense<0.000000e+00> : vector<8x8xf32>
    %117 = tpu.matmul %115, %116, %cst_54 {dimension_numbers = #tpu.dot_dimension_numbers<[1], [0], [0], [1], [0, 0, 1, 1], [], []>} : vector<8x8xf32>, vector<8x8xf32>, vector<8x8xf32> -> vector<8x8xf32>
    %118 = vector.extract_strided_slice %2 {offsets = [24, 0], sizes = [8, 32], strides = [1, 1]} : vector<32x32xf32> to vector<8x32xf32>
    %cst_55 = arith.constant dense<0.000000e+00> : vector<8x32xf32>
    %119 = tpu.matmul %117, %118, %cst_55 {dimension_numbers = #tpu.dot_dimension_numbers<[1], [0], [0], [1], [0, 0, 1, 1], [], []>} : vector<8x8xf32>, vector<8x32xf32>, vector<8x32xf32> -> vector<8x32xf32>
    %120 = arith.addf %114, %119 : vector<8x32xf32>
    %121 = tpu.concatenate %95, %120 in 0 : vector<8x32xf32>, vector<8x32xf32> -> vector<16x32xf32>
    %122 = vector.broadcast %6 : vector<1x32xf32> to vector<16x32xf32>
    %123 = arith.addf %121, %122 : vector<16x32xf32>
    %124 = arith.addf %16, %123 : vector<16x32xf32>
    %cst_56 = arith.constant dense<0.000000e+00> : vector<16xf32>
    %125 = vector.multi_reduction <add>, %124, %cst_56 [1] : vector<16x32xf32> to vector<16xf32>
    %126 = vector.shape_cast %125 : vector<16xf32> to vector<16x1xf32>
    %cst_57 = arith.constant 3.200000e+01 : f32
    %127 = vector.broadcast %cst_57 : f32 to vector<16x1xf32>
    %128 = arith.divf %126, %127 : vector<16x1xf32>
    %129 = vector.broadcast %128 : vector<16x1xf32> to vector<16x32xf32>
    %130 = arith.subf %124, %129 : vector<16x32xf32>
    %131 = arith.mulf %130, %130 : vector<16x32xf32>
    %cst_58 = arith.constant dense<0.000000e+00> : vector<16xf32>
    %132 = vector.multi_reduction <add>, %131, %cst_58 [1] : vector<16x32xf32> to vector<16xf32>
    %133 = vector.shape_cast %132 : vector<16xf32> to vector<16x1xf32>
    %cst_59 = arith.constant 3.200000e+01 : f32
    %134 = vector.broadcast %cst_59 : f32 to vector<16x1xf32>
    %135 = arith.divf %133, %134 : vector<16x1xf32>
    %136 = vector.broadcast %128 : vector<16x1xf32> to vector<16x32xf32>
    %137 = arith.subf %124, %136 : vector<16x32xf32>
    %cst_60 = arith.constant 9.99999974E-6 : f32
    %138 = vector.broadcast %cst_60 : f32 to vector<16x1xf32>
    %139 = arith.addf %135, %138 : vector<16x1xf32>
    %140 = math.rsqrt %139 : vector<16x1xf32>
    %141 = vector.broadcast %140 : vector<16x1xf32> to vector<16x32xf32>
    %142 = arith.mulf %137, %141 : vector<16x32xf32>
    %143 = vector.broadcast %7 : vector<1x32xf32> to vector<16x32xf32>
    %144 = arith.mulf %142, %143 : vector<16x32xf32>
    %145 = vector.broadcast %8 : vector<1x32xf32> to vector<16x32xf32>
    %146 = arith.addf %144, %145 : vector<16x32xf32>
    %cst_61 = arith.constant dense<0.000000e+00> : vector<16x64xf32>
    %147 = tpu.matmul %146, %3, %cst_61 {dimension_numbers = #tpu.dot_dimension_numbers<[1], [0], [0], [1], [0, 0, 1, 1], [], []>} : vector<16x32xf32>, vector<32x64xf32>, vector<16x64xf32> -> vector<16x64xf32>
    %148 = vector.broadcast %9 : vector<1x64xf32> to vector<16x64xf32>
    %149 = arith.addf %147, %148 : vector<16x64xf32>
    %cst_62 = arith.constant 0.000000e+00 : f32
    %150 = vector.broadcast %cst_62 : f32 to vector<16x64xf32>
    %151 = arith.maximumf %149, %150 : vector<16x64xf32>
    %cst_63 = arith.constant dense<0.000000e+00> : vector<16x32xf32>
    %152 = tpu.matmul %151, %4, %cst_63 {dimension_numbers = #tpu.dot_dimension_numbers<[1], [0], [0], [1], [0, 0, 1, 1], [], []>} : vector<16x64xf32>, vector<64x32xf32>, vector<16x32xf32> -> vector<16x32xf32>
    %153 = vector.broadcast %10 : vector<1x32xf32> to vector<16x32xf32>
    %154 = arith.addf %152, %153 : vector<16x32xf32>
    %155 = arith.addf %146, %154 : vector<16x32xf32>
    %cst_64 = arith.constant dense<0.000000e+00> : vector<16xf32>
    %156 = vector.multi_reduction <add>, %155, %cst_64 [1] : vector<16x32xf32> to vector<16xf32>
    %157 = vector.shape_cast %156 : vector<16xf32> to vector<16x1xf32>
    %cst_65 = arith.constant 3.200000e+01 : f32
    %158 = vector.broadcast %cst_65 : f32 to vector<16x1xf32>
    %159 = arith.divf %157, %158 : vector<16x1xf32>
    %160 = vector.broadcast %159 : vector<16x1xf32> to vector<16x32xf32>
    %161 = arith.subf %155, %160 : vector<16x32xf32>
    %162 = arith.mulf %161, %161 : vector<16x32xf32>
    %cst_66 = arith.constant dense<0.000000e+00> : vector<16xf32>
    %163 = vector.multi_reduction <add>, %162, %cst_66 [1] : vector<16x32xf32> to vector<16xf32>
    %164 = vector.shape_cast %163 : vector<16xf32> to vector<16x1xf32>
    %cst_67 = arith.constant 3.200000e+01 : f32
    %165 = vector.broadcast %cst_67 : f32 to vector<16x1xf32>
    %166 = arith.divf %164, %165 : vector<16x1xf32>
    %167 = vector.broadcast %159 : vector<16x1xf32> to vector<16x32xf32>
    %168 = arith.subf %155, %167 : vector<16x32xf32>
    %cst_68 = arith.constant 9.99999974E-6 : f32
    %169 = vector.broadcast %cst_68 : f32 to vector<16x1xf32>
    %170 = arith.addf %166, %169 : vector<16x1xf32>
    %171 = math.rsqrt %170 : vector<16x1xf32>
    %172 = vector.broadcast %171 : vector<16x1xf32> to vector<16x32xf32>
    %173 = arith.mulf %168, %172 : vector<16x32xf32>
    %174 = vector.broadcast %11 : vector<1x32xf32> to vector<16x32xf32>
    %175 = arith.mulf %173, %174 : vector<16x32xf32>
    %176 = vector.broadcast %12 : vector<1x32xf32> to vector<16x32xf32>
    %177 = arith.addf %175, %176 : vector<16x32xf32>
    %c0_69 = arith.constant 0 : index
    %c0_70 = arith.constant 0 : index
    %178 = vector.load %arg5[%c0_69, %c0_70] : memref<16x32xf32, #tpu.memory_space<vmem>>, vector<16x32xf32>
    tpu.vector_store %arg5[%c0_69, %c0_70], %177 {strides = array<i32>} : memref<16x32xf32, #tpu.memory_space<vmem>>, vector<16x32xf32>,
    return
  }
  func.func @transform_0(%arg0: i32) -> (i32, i32) {
    %c0_i32 = arith.constant 0 : i32
    %c0_i32_0 = arith.constant 0 : i32
    %c0_i32_1 = arith.constant 0 : i32
    return %c0_i32, %c0_i32_0 : i32, i32
  }
  func.func @transform_1(%arg0: i32) -> (i32, i32) {
    %c0_i32 = arith.constant 0 : i32
    %c0_i32_0 = arith.constant 0 : i32
    %c0_i32_1 = arith.constant 0 : i32
    return %c0_i32, %c0_i32_0 : i32, i32
  }
  func.func @transform_2(%arg0: i32) -> (i32, i32) {
    %c0_i32 = arith.constant 0 : i32
    %c0_i32_0 = arith.constant 0 : i32
    %c0_i32_1 = arith.constant 0 : i32
    return %c0_i32, %c0_i32_0 : i32, i32
  }
  func.func @transform_3(%arg0: i32) -> (i32, i32) {
    %c0_i32 = arith.constant 0 : i32
    %c0_i32_0 = arith.constant 0 : i32
    %c0_i32_1 = arith.constant 0 : i32
    return %c0_i32, %c0_i32_0 : i32, i32
  }
  func.func @transform_4(%arg0: i32) -> (i32, i32) {
    %c0_i32 = arith.constant 0 : i32
    %c0_i32_0 = arith.constant 0 : i32
    %c0_i32_1 = arith.constant 0 : i32
    return %c0_i32, %c0_i32_0 : i32, i32
  }
}

</mosaic_0001>

<bundles_post_ra>
// kernel: transformer_ts_mapping_block.1
= control target key start
LH: loop header
LB: loop body
LE: loop exit
PB: predicated region body
PF: predicated region fallthrough
CT: control target
= control target key end

     0   :  { %9 = vsyncpa [#allocation3], 0  ;;  %s3212_s0 = inlined_call_operand.vmem [shape: f32[16,64], index: 0, kind: input, shape index: {}]   ;;  %s3213_s1 = inlined_call_operand.vmem [shape: f32[16,32], index: 1, kind: input, shape index: {}]   ;;  %s3214_s2 = inlined_call_operand.hbm [shape: f32[96,384], index: 2, kind: input, shape index: {}]   ;;  %s3215_s3 = inlined_call_operand.vmem [shape: f32[8,128], index: 3, kind: input, shape index: {}]   ;;  %s3216_s4 = inlined_call_operand.hbm [shape: f32[16,32], index: 4, kind: output, shape index: {}]  }
   0x1   :  { %10 = vsyncpa [#allocation4], 0  ;;  %s2892_s15 = smov [#allocation2]   ;;  %s2844_s19 = scalar_lea.hbm %s3214_s2, 4608 }
   0x2   :  { %s20_s16 = sshll.u32 %s2892_s15, 4  ;;  %p2845_p0 = scmp.ne.s32.totalorder %s3214_s2, %s2844_s19  ;;  %s21_s16 = int_to_ptr.vmem [resolvable:$true] %s20_s16 }
   0x3   :  { %p2848_p1 = scmp.lt.u32.totalorder %s2844_s19, %s3214_s2 }
   0x5   :  { %p2850_p2 = pnand %p2848_p1, %p2845_p0 }
   0x7   :  { %2853 = shalt.err (!%p2850_p2)
}
   0x8   :  { %s2854_s24 = scalar_lea.vmem %s21_s16, 4608  ;;  %p2859_p4 = scmp.lt.s32.totalorder %s21_s16, %s21_s16 }
   0x9   :  { %p2855_p3 = scmp.ne.s32.totalorder %s21_s16, %s2854_s24  ;;  %p2860_p5 = scmp.lt.s32.totalorder %s2854_s24, %s2854_s24 }
   0xb   :  { %p2861_p6 = por %p2860_p5, %p2859_p4 }
   0xd   :  { %p2862_p7 = pnand %p2861_p6, %p2855_p3 }
   0xf   :  { %2865 = shalt.err (!%p2862_p7)
}
  0x10   :  { %s2893_s25 = smov 384   ;;  %s2894_s26 = smov 24  }
  0x11   :  { %26 = dma.hbm_to_vmem [thread:$0]  %s3214_s2, 4608, %s21_s16, [#allocation3], %s2893_s25, %s2893_s25, %s2894_s26  }
  0x12   :  { %2888 = dma.done.wait [#allocation3], 4608  }
  0x13   :  { %2889 = vsyncadd [#allocation3], 4294962688  ;;  %v32_v0 = vld [vmem:[#allocation2 + $0x60] sm:$0xff]  ;;  %v33_v1 = vld [vmem:[#allocation2 + $0x78] sm:$0xff]  ;;  %vm72_vm0 = vcmask 523264   ;;  %vm158_vm1 = vcmask 261120  }
  0x14   :  { %v34_v2 = vld [vmem:[#allocation2 + $0x90] sm:$0xff]  ;;  %v2737_v3 = vpack.c.bf16 %v33_v1, %v32_v0  ;;  %v35_v4 = vld [vmem:[#allocation2 + $0xa8] sm:$0xff]  ;;  %v36_v6 = vld [vmem:[#allocation2 + $0xc0] sm:$0xff]  ;;  %v2895_v26 = vmov 0.0   ;;  %vm2896_vm2 = vmmov 0   ;;  %s2897_s10 = smov 96  }
  0x15   :  { %v2741_v5 = vpack.c.bf16 %v35_v4, %v34_v2  ;;  %v37_v7 = vld [vmem:[#allocation2 + $0xd8] sm:$0xff]  ;;  %v68_v8 = vld [vmem:[%s3212_s0] sm:$0xff]  ;;  %v40_v9 = vld [vmem:[#allocation2] sm:$0xff]  ;;  %s2898_s11 = smov 88   ;;  %s2899_s12 = smov 80   ;;  %vm244_vm3 = vcmask 64512  }
  0x16   :  { %2738 = vmatprep.subr.bf16.mxu0 %v2737_v3  ;;  %2573 = vmatprep.mubr.msk.f32.mxu0 %vm72_vm0, %v68_v8  ;;  %v41_v10 = vld [vmem:[#allocation2 + $0x18] sm:$0xff]  ;;  %v2745_v12 = vpack.c.bf16 %v37_v7, %v36_v6  ;;  %v38_v13 = vld [vmem:[#allocation2 + $0xf0] sm:$0xff]  ;;  %v39_v14 = vld [vmem:[#allocation2 + $0x108] sm:$0xff]  ;;  %s2900_s13 = smov 120   ;;  %s2901_s14 = smov 72  }
  0x17   :  { %2740 = vmatpush3.bf16.msra.mxu0 %v2737_v3  ;;  %v2753_v11 = vpack.c.bf16 %v41_v10, %v40_v9  ;;  %v2749_v15 = vpack.c.bf16 %v39_v14, %v38_v13  ;;  %v69_v16 = vld [vmem:[%s3212_s0 + $0x8] sm:$0xff]  ;;  %v42_v17 = vld [vmem:[#allocation2 + $0x30] sm:$0xff]  ;;  %v43_v18 = vld [vmem:[#allocation2 + $0x48] sm:$0xff]  ;;  %s2902_s15 = smov 112   ;;  %s2903_s16 = smov 104  }
  0x18   :  { %2742 = vmatprep.subr.bf16.mxu0 %v2741_v5  ;;  %v2757_v19 = vpack.c.bf16 %v43_v18, %v42_v17  ;;  %v70_v20 = vld [vmem:[%s3213_s1] sm:$0xff]  ;;  %v71_v21 = vld [vmem:[%s3213_s1 + $0x8] sm:$0xff]  ;;  %s2904_s17 = smov 56   ;;  %s2905_s18 = smov 64  }
  0x19   :  { %2754 = vmatprep.subr.bf16.mxu1 %v2753_v11  ;;  %v2431_v27 = vld [vmem:[%s3215_s3] ss:$0 sm:$0xff]  ;;  %s2906_s19 = smov 40   ;;  %s2907_s20 = smov 48  }
  0x1a   :  { %2756 = vmatpush3.bf16.msra.mxu1 %v2753_v11  ;;  %s2908_s8 = smov [#allocation5]  }
  0x1b   :  { %2744 = vmatpush3.bf16.msra.mxu0 %v2741_v5  ;;  %2758 = vmatprep.subr.bf16.mxu1 %v2757_v19  ;;  %s2417_s9 = sshll.u32 %s2908_s8, 4  ;;  %s2418_s9 = int_to_ptr.vmem [resolvable:$true] %s2417_s9 }
  0x1c   :  { %2746 = vmatprep.subr.bf16.mxu0 %v2745_v12  ;;  %s2866_s0 = scalar_lea.vmem %s2418_s9, 256  ;;  %p2871_p9 = scmp.lt.s32.totalorder %s2418_s9, %s2418_s9 }
  0x1d   :  { %p2867_p8 = scmp.ne.s32.totalorder %s2418_s9, %s2866_s0  ;;  %p2872_p10 = scmp.lt.s32.totalorder %s2866_s0, %s2866_s0 }
  0x1e   :  { %2760 = vmatpush3.bf16.msra.mxu1 %v2757_v19 }
  0x1f   :  { %2748 = vmatpush3.bf16.msra.mxu0 %v2745_v12  ;;  %2592 = vmatprep.subr.mxu1 %v2895_v26  ;;  %p2873_p11 = por %p2872_p10, %p2871_p9 }
  0x20   :  { %2750 = vmatprep.subr.bf16.mxu0 %v2749_v15 }
  0x21   :  { %p2874_p12 = pnand %p2873_p11, %p2867_p8 }
  0x23   :  { %2752 = vmatpush3.bf16.msra.mxu0 %v2749_v15 }
  0x24   :  { %2587 = vmatprep.subr.mxu0 %v2895_v26 }
  0x26   :  { %2574 = vmatmul.mubr.msk.f32.vlgmr.msra.gmra.mrb[0].mxu0 %vm72_vm0, %v69_v16 }
  0x27   :  { %2589 = vmatprep.mubr.msk.f32.mxu0 %vm2896_vm2, %v2895_v26 }
  0xf9   :  { %v2575_v22 = vpop.f32.mrb[0].mxu0 }
  0xfa   :  { %v145_v23 = vpop.f32.mrb[1].mxu0  ;;  %v2964_v25 = vadd.f32 %v2575_v22, %v71_v21 }
  0xfb   :  { %v2962_v24 = vadd.f32 %v145_v23, %v70_v20 }
  0xfd   :  { %2584 = vmatprep.mubr.msk.f32.mxu1 %vm158_vm1, %v2962_v24 }
  0xfe   :  { %2585 = vmatmul.mubr.msk.f32.vlgmr.msra.gmra.mrb[0].mxu1 %vm158_vm1, %v2964_v25 }
  0xff   :  { %2594 = vmatprep.mubr.msk.f32.mxu1 %vm2896_vm2, %v2895_v26 }
 0x1d1   :  { %v2586_v28 = vpop.f32.mrb[0].mxu1 }
 0x1d2   :  { %v231_v29 = vpop.f32.mrb[1].mxu1  ;;  %v2992_v32 = vadd.f32 %v2586_v28, %v2431_v27 }
 0x1d3   :  { %v2979_v30 = vadd.f32 %v2431_v27, %v231_v29 }
 0x1d4   :  { %v554_v50 = vmul.f32 0.35355338, %v2992_v32 }
 0x1d5   :  { %242 = vrot.lane.b32.xlu1 %v2979_v30, %s2897_s10  ;;  %322 = vrot.lane.b32.xlu0 %v2979_v30, %s2898_s11  ;;  %v240_v31 = vmul.f32 0.35355338, %v2979_v30 }
 0x1d9   :  { %400 = vrot.lane.b32.xlu1 %v2979_v30, %s2899_s12  ;;  %320 = vrot.lane.b32.xlu0 %v240_v31, %s2900_s13 }
 0x1dd   :  { %478 = vrot.lane.b32.xlu1 %v2979_v30, %s2901_s14  ;;  %398 = vrot.lane.b32.xlu0 %v240_v31, %s2902_s15 }
 0x1e1   :  { %476 = vrot.lane.b32.xlu0 %v240_v31, %s2903_s16 }
 0x1e5   :  { %635 = vrot.lane.b32.xlu0 %v2992_v32, %s2898_s11 }
 0x247   :  { %v243_v33 = vpop.permute.xlu1 %242  ;;  %v323_v34 = vpop.permute.xlu0 %322 }
 0x248   :  { %2588 = vmatpush3.xpose.msk.msra.mxu0 %vm244_vm3, %v243_v33  ;;  %2593 = vmatpush3.xpose.msk.msra.mxu1 %vm244_vm3, %v323_v34 }
 0x249   :  { %2597 = vmatprep.subr.mxu0 %v2895_v26  ;;  %2602 = vmatprep.subr.mxu1 %v2895_v26 }
 0x24b   :  { %v401_v35 = vpop.permute.xlu1 %400  ;;  %v321_v36 = vpop.permute.xlu0 %320  ;;  %2590 = vmatmul.mubr.msk.f32.vlgmr.msra.gmra.mrb[2].mxu0 %vm244_vm3, %v240_v31 }
 0x24c   :  { %2595 = vmatmul.mubr.msk.f32.vlgmr.msra.gmra.mrb[2].mxu1 %vm244_vm3, %v321_v36  ;;  %2598 = vmatpush3.xpose.msk.msra.mxu0 %vm244_vm3, %v401_v35 }
 0x24d   :  { %2599 = vmatprep.mubr.msk.f32.mxu0 %vm2896_vm2, %v2895_v26  ;;  %2604 = vmatprep.mubr.msk.f32.mxu1 %vm2896_vm2, %v2895_v26 }
 0x24e   :  { %2607 = vmatprep.subr.mxu0 %v2895_v26 }
 0x24f   :  { %v479_v37 = vpop.permute.xlu1 %478  ;;  %v399_v38 = vpop.permute.xlu0 %398 }
 0x250   :  { %2600 = vmatmul.mubr.msk.f32.vlgmr.msra.gmra.mrb[4].mxu0 %vm244_vm3, %v399_v38  ;;  %2603 = vmatpush3.xpose.msk.msra.mxu1 %vm244_vm3, %v479_v37 }
 0x251   :  { %2612 = vmatprep.subr.mxu1 %v2895_v26  ;;  %2609 = vmatprep.mubr.msk.f32.mxu0 %vm2896_vm2, %v2895_v26 }
 0x253   :  { %v477_v39 = vpop.permute.xlu0 %476 }
 0x254   :  { %2605 = vmatmul.mubr.msk.f32.vlgmr.msra.gmra.mrb[4].mxu1 %vm244_vm3, %v477_v39 }
 0x255   :  { %2614 = vmatprep.mubr.msk.f32.mxu1 %vm2896_vm2, %v2895_v26 }
 0x257   :  { %v636_v40 = vpop.permute.xlu0 %635 }
 0x258   :  { %2613 = vmatpush3.xpose.msk.msra.mxu1 %vm244_vm3, %v636_v40 }
 0x259   :  { %2622 = vmatprep.subr.mxu1 %v2895_v26 }
 0x31e   :  { %v3017_v41 = vpop.f32.mrb[2].mxu0 }
 0x31f   :  { %v2591_v42 = vpop.f32.mrb[3].mxu0  ;;  %v394_v43 = vpop.f32.mrb[2].mxu1  ;;  %v867_v0 = vsel %vm244_vm3, %v3017_v41, -inf }
 0x320   :  { %v2596_v44 = vpop.f32.mrb[3].mxu1  ;;  %v870_v45 = vsel %vm244_vm3, %v394_v43, -inf }
 0x321   :  { %871 = vmax.xlane.f32.xlu1 %v870_v45 }
 0x323   :  { %v472_v46 = vpop.f32.mrb[4].mxu0 }
 0x324   :  { %v2601_v47 = vpop.f32.mrb[5].mxu0  ;;  %v873_v51 = vsel %vm244_vm3, %v472_v46, -inf }
 0x327   :  { %v3020_v48 = vpop.f32.mrb[4].mxu1 }
 0x328   :  { %v2606_v49 = vpop.f32.mrb[5].mxu1  ;;  %v876_v1 = vsel %vm244_vm3, %v3020_v48, -inf }
 0x332   :  { %633 = vrot.lane.b32.xlu1 %v554_v50, %s2900_s13 }
 0x336   :  { %791 = vrot.lane.b32.xlu1 %v2992_v32, %s2901_s14 }
 0x33a   :  { %1031 = vrot.lane.b32.xlu1 %v2979_v30, %s2904_s17 }
 0x35e   :  { %874 = vmax.xlane.f32.xlu1 %v873_v51 }
 0x36f   :  { %556 = vrot.lane.b32.xlu1 %v2992_v32, %s2897_s10 }
 0x373   :  { %711 = vrot.lane.b32.xlu1 %v554_v50, %s2902_s15 }
 0x377   :  { %955 = vrot.lane.b32.xlu1 %v2979_v30, %s2905_s18 }
 0x3ae   :  { %v872_v52 = vpop.xlane.xlu1 %871 }
 0x3af   :  { %v892_v53 = vsub.f32 %v394_v43, %v872_v52 }
 0x3b1   :  { %v901_v54 = vmul.f32 1.442695, %v892_v53 }
 0x3b2   :  { %v634_v55 = vpop.permute.xlu1 %633 }
 0x3b3   :  { %2804 = vpow2.f32 %v901_v54  ;;  %2615 = vmatmul.mubr.msk.f32.vlgmr.msra.gmra.mrb[6].mxu1 %vm244_vm3, %v634_v55 }
 0x3b4   :  { %2624 = vmatprep.mubr.msk.f32.mxu1 %vm2896_vm2, %v2895_v26 }
 0x3b6   :  { %v792_v56 = vpop.permute.xlu1 %791 }
 0x3b7   :  { %2623 = vmatpush3.xpose.msk.msra.mxu1 %vm244_vm3, %v792_v56  ;;  %v44_v56 = vld [vmem:[#allocation2 + $0x8] sm:$0xff] }
 0x3b8   :  { %2632 = vmatprep.subr.mxu1 %v2895_v26 }
 0x3ba   :  { %v1032_v59 = vpop.permute.xlu1 %1031 }
 0x3bd   :  { %v2805_v57 = vpop.eup %2804 }
 0x3be   :  { %v918_v58 = vsel %vm244_vm3, %v2805_v57, 0.0 }
 0x3bf   :  { %919 = vadd.xlane.f32.xlu0 %v918_v58 }
 0x3d5   :  { %789 = vrot.lane.b32.xlu0 %v554_v50, %s2903_s16 }
 0x3eb   :  { %v875_v60 = vpop.xlane.xlu1 %874 }
 0x3ec   :  { %v893_v61 = vsub.f32 %v472_v46, %v875_v60 }
 0x3ee   :  { %v903_v62 = vmul.f32 1.442695, %v893_v61 }
 0x3ef   :  { %v557_v63 = vpop.permute.xlu1 %556 }
 0x3f0   :  { %2806 = vpow2.f32 %v903_v62  ;;  %2608 = vmatpush3.xpose.msk.msra.mxu0 %vm244_vm3, %v557_v63  ;;  %v3107_v63 = vld [vmem:[#allocation2 + $0x38] sm:$0xff] }
 0x3f1   :  { %2617 = vmatprep.subr.mxu0 %v2895_v26 }
 0x3f3   :  { %2610 = vmatmul.mubr.msk.f32.vlgmr.msra.gmra.mrb[6].mxu0 %vm244_vm3, %v554_v50  ;;  %v712_v14 = vpop.permute.xlu1 %711 }
 0x3f4   :  { %868 = vmax.xlane.f32.xlu0 %v867_v0  ;;  %2619 = vmatprep.mubr.msk.f32.mxu0 %vm2896_vm2, %v2895_v26 }
 0x3f7   :  { %v956_v18 = vpop.permute.xlu1 %955 }
 0x3f8   :  { %877 = vmax.xlane.f32.xlu0 %v876_v1 }
 0x3fa   :  { %v3050_v2 = vpop.eup %2806 }
 0x3fb   :  { %v921_v3 = vsel %vm244_vm3, %v3050_v2, 0.0 }
 0x3fc   :  { %922 = vadd.xlane.f32.xlu1 %v921_v3 }
 0x40d   :  { %1403 = vrot.lane.b32.xlu1 %v2979_v30, %s2906_s19 }
 0x40e   :  { %713 = vrot.lane.b32.xlu0 %v2992_v32, %s2899_s12 }
 0x44c   :  { %v920_v4 = vpop.xlane.xlu0 %919 }
 0x44d   :  { %2808 = vrcp.f32 %v920_v4 }
 0x450   :  { %v790_v5 = vpop.permute.xlu0 %789 }
 0x451   :  { %2625 = vmatmul.mubr.msk.f32.vlgmr.msra.gmra.mrb[8].mxu1 %vm244_vm3, %v790_v5 }
 0x452   :  { %2633 = vmatpush3.msra.mxu1 %v1032_v59  ;;  %2634 = vmatprep.mubr.msk.f32.mxu1 %vm2896_vm2, %v2895_v26 }
 0x453   :  { %2642 = vmatprep.subr.mxu1 %v2895_v26 }
 0x457   :  { %v2809_v6 = vpop.eup %2808 }
 0x458   :  { %v948_v7 = vmul.f32 %v2809_v6, %v2805_v57 }
 0x45a   :  { %2635 = vmatmul.mubr.msk.f32.vlgmr.msra.gmra.mrb[10].mxu1 %vm244_vm3, %v948_v7 }
 0x45b   :  { %2644 = vmatprep.mubr.msk.f32.mxu1 %vm2896_vm2, %v2895_v26  ;;  %2643 = vmatpush3.msra.mxu1 %v44_v56 }
 0x45c   :  { %2652 = vmatprep.subr.mxu1 %v2895_v26 }
 0x481   :  { %v869_v8 = vpop.xlane.xlu0 %868 }
 0x482   :  { %v891_v9 = vsub.f32 %v3017_v41, %v869_v8  ;;  %v3115_v8 = vld [vmem:[#allocation2 + $0x50] sm:$0xff] }
 0x484   :  { %v899_v10 = vmul.f32 1.442695, %v891_v9 }
 0x485   :  { %v878_v11 = vpop.xlane.xlu0 %877 }
 0x486   :  { %2810 = vpow2.f32 %v899_v10  ;;  %v894_v12 = vsub.f32 %v3020_v48, %v878_v11  ;;  %v707_v13 = vpop.f32.mrb[6].mxu1 }
 0x487   :  { %v2616_v15 = vpop.f32.mrb[7].mxu1  ;;  %v882_v28 = vsel %vm244_vm3, %v707_v13, -inf }
 0x488   :  { %v905_v16 = vmul.f32 1.442695, %v894_v12 }
 0x489   :  { %v714_v17 = vpop.permute.xlu0 %713  ;;  %v923_v31 = vpop.xlane.xlu1 %922 }
 0x48a   :  { %2812 = vpow2.f32 %v905_v16  ;;  %2618 = vmatpush3.xpose.msk.msra.mxu0 %vm244_vm3, %v714_v17 }
 0x48b   :  { %2627 = vmatprep.subr.mxu0 %v2895_v26 }
 0x48d   :  { %2620 = vmatmul.mubr.msk.f32.vlgmr.msra.gmra.mrb[8].mxu0 %vm244_vm3, %v712_v14  ;;  %v1404_v44 = vpop.permute.xlu1 %1403 }
 0x48e   :  { %2628 = vmatpush3.msra.mxu0 %v956_v18  ;;  %2629 = vmatprep.mubr.msk.f32.mxu0 %vm2896_vm2, %v2895_v26 }
 0x48f   :  { %2637 = vmatprep.subr.mxu0 %v2895_v26 }
 0x490   :  { %v2811_v19 = vpop.eup %2810 }
 0x491   :  { %v915_v20 = vsel %vm244_vm3, %v2811_v19, 0.0 }
 0x492   :  { %916 = vadd.xlane.f32.xlu0 %v915_v20 }
 0x494   :  { %v2813_v21 = vpop.eup %2812 }
 0x495   :  { %v924_v22 = vsel %vm244_vm3, %v2813_v21, 0.0 }
 0x496   :  { %925 = vadd.xlane.f32.xlu0 %v924_v22 }
 0x4ac   :  { %1253 = vrot.lane.b32.xlu0 %v2979_v30, %s2907_s20  ;;  %v3082_v30 = vld [vmem:[#allocation2 + $0x20] sm:$0xff] }
 0x4c6   :  { %v629_v23 = vpop.f32.mrb[6].mxu0 }
 0x4c7   :  { %v2611_v27 = vpop.f32.mrb[7].mxu0  ;;  %v879_v53 = vsel %vm244_vm3, %v629_v23, -inf }
 0x4cb   :  { %883 = vmax.xlane.f32.xlu0 %v882_v28 }
 0x4e1   :  { %1629 = vrot.lane.b32.xlu0 %v2992_v32, %s2904_s17 }
 0x51f   :  { %v917_v29 = vpop.xlane.xlu0 %916 }
 0x520   :  { %2814 = vrcp.f32 %v917_v29 }
 0x521   :  { %2816 = vrcp.f32 %v923_v31 }
 0x523   :  { %v926_v35 = vpop.xlane.xlu0 %925 }
 0x524   :  { %v3080_v33 = vpop.f32.mrb[8].mxu1  ;;  %2818 = vrcp.f32 %v926_v35 }
 0x525   :  { %v2626_v34 = vpop.f32.mrb[9].mxu1  ;;  %v888_v55 = vsel %vm244_vm3, %v3080_v33, -inf }
 0x527   :  { %v1254_v41 = vpop.permute.xlu0 %1253 }
 0x52a   :  { %v2815_v36 = vpop.eup %2814 }
 0x52b   :  { %v947_v37 = vmul.f32 %v2815_v36, %v2811_v19  ;;  %v2817_v40 = vpop.eup %2816 }
 0x52c   :  { %v949_v42 = vmul.f32 %v2817_v40, %v3050_v2 }
 0x52d   :  { %2630 = vmatmul.mubr.msk.f32.vlgmr.msra.gmra.mrb[10].mxu0 %vm244_vm3, %v947_v37  ;;  %v1103_v38 = vpop.f32.mrb[10].mxu1 }
 0x52e   :  { %2638 = vmatpush3.msra.mxu0 %v3082_v30  ;;  %v2636_v39 = vpop.f32.mrb[11].mxu1  ;;  %2639 = vmatprep.mubr.msk.f32.mxu0 %vm2896_vm2, %v2895_v26  ;;  %v2819_v43 = vpop.eup %2818 }
 0x52f   :  { %2647 = vmatprep.subr.mxu0 %v2895_v26  ;;  %v950_v45 = vmul.f32 %v2819_v43, %v2813_v21 }
 0x531   :  { %2640 = vmatmul.mubr.msk.f32.vlgmr.msra.gmra.mrb[12].mxu0 %vm244_vm3, %v1103_v38  ;;  %v2466_v38 = vld [vmem:[%s3215_s3 + $0x1] ss:$0 sm:$0xff] }
 0x532   :  { %2648 = vmatpush3.msra.mxu0 %v1254_v41  ;;  %2649 = vmatprep.mubr.msk.f32.mxu0 %vm2896_vm2, %v2895_v26 }
 0x533   :  { %2657 = vmatprep.subr.mxu0 %v2895_v26 }
 0x535   :  { %2650 = vmatmul.mubr.msk.f32.vlgmr.msra.gmra.mrb[14].mxu0 %vm244_vm3, %v949_v42 }
 0x536   :  { %2658 = vmatpush3.msra.mxu0 %v1404_v44  ;;  %2659 = vmatprep.mubr.msk.f32.mxu0 %vm2896_vm2, %v2895_v26 }
 0x537   :  { %2667 = vmatprep.subr.mxu0 %v2895_v26 }
 0x539   :  { %2660 = vmatmul.mubr.msk.f32.vlgmr.msra.gmra.mrb[16].mxu0 %vm244_vm3, %v950_v45 }
 0x53a   :  { %2669 = vmatprep.mubr.msk.f32.mxu0 %vm2896_vm2, %v2895_v26 }
 0x558   :  { %v884_v46 = vpop.xlane.xlu0 %883 }
 0x559   :  { %v896_v47 = vsub.f32 %v707_v13, %v884_v46 }
 0x55b   :  { %v909_v48 = vmul.f32 1.442695, %v896_v47 }
 0x55c   :  { %v1630_v16 = vpop.permute.xlu0 %1629 }
 0x55d   :  { %2820 = vpow2.f32 %v909_v48 }
 0x560   :  { %v785_v49 = vpop.f32.mrb[8].mxu0 }
 0x561   :  { %v2621_v50 = vpop.f32.mrb[9].mxu0  ;;  %v885_v54 = vsel %vm244_vm3, %v785_v49, -inf }
 0x567   :  { %v2821_v51 = vpop.eup %2820 }
 0x568   :  { %v930_v52 = vsel %vm244_vm3, %v2821_v51, 0.0 }
 0x569   :  { %931 = vadd.xlane.f32.xlu1 %v930_v52 }
 0x56d   :  { %880 = vmax.xlane.f32.xlu1 %v879_v53 }
 0x571   :  { %886 = vmax.xlane.f32.xlu1 %v885_v54 }
 0x575   :  { %889 = vmax.xlane.f32.xlu1 %v888_v55 }
 0x5f6   :  { %v932_v57 = vpop.xlane.xlu1 %931 }
 0x5fa   :  { %v881_v58 = vpop.xlane.xlu1 %880 }
 0x5fb   :  { %v895_v59 = vsub.f32 %v629_v23, %v881_v58 }
 0x5fd   :  { %v907_v60 = vmul.f32 1.442695, %v895_v59 }
 0x5fe   :  { %v887_v61 = vpop.xlane.xlu1 %886 }
 0x5ff   :  { %2822 = vpow2.f32 %v907_v60  ;;  %v897_v62 = vsub.f32 %v785_v49, %v887_v61 }
 0x600   :  { %v1027_v0 = vpop.f32.mrb[10].mxu0  ;;  %2824 = vrcp.f32 %v932_v57 }
 0x601   :  { %v911_v1 = vmul.f32 1.442695, %v897_v62  ;;  %v2631_v2 = vpop.f32.mrb[11].mxu0  ;;  %2645 = vmatmul.mubr.msk.f32.vlgmr.msra.gmra.mrb[12].mxu1 %vm244_vm3, %v1027_v0 }
 0x602   :  { %v890_v3 = vpop.xlane.xlu1 %889  ;;  %2653 = vmatpush3.msra.mxu1 %v3107_v63  ;;  %2654 = vmatprep.mubr.msk.f32.mxu1 %vm2896_vm2, %v2895_v26 }
 0x603   :  { %2826 = vpow2.f32 %v911_v1  ;;  %v898_v4 = vsub.f32 %v3080_v33, %v890_v3  ;;  %2662 = vmatprep.subr.mxu1 %v2895_v26 }
 0x604   :  { %v1176_v5 = vpop.f32.mrb[12].mxu0 }
 0x605   :  { %v913_v6 = vmul.f32 1.442695, %v898_v4  ;;  %v2641_v7 = vpop.f32.mrb[13].mxu0 }
 0x607   :  { %2828 = vpow2.f32 %v913_v6 }
 0x608   :  { %v1325_v9 = vpop.f32.mrb[14].mxu0 }
 0x609   :  { %v2823_v10 = vpop.eup %2822  ;;  %v2651_v11 = vpop.f32.mrb[15].mxu0  ;;  %2655 = vmatmul.mubr.msk.f32.vlgmr.msra.gmra.mrb[14].mxu1 %vm244_vm3, %v1325_v9 }
 0x60a   :  { %2663 = vmatpush3.msra.mxu1 %v3115_v8  ;;  %v927_v12 = vsel %vm244_vm3, %v2823_v10, 0.0  ;;  %2664 = vmatprep.mubr.msk.f32.mxu1 %vm2896_vm2, %v2895_v26  ;;  %v2825_v13 = vpop.eup %2824 }
 0x60b   :  { %928 = vadd.xlane.f32.xlu1 %v927_v12  ;;  %2672 = vmatprep.subr.mxu1 %v2895_v26  ;;  %v952_v19 = vmul.f32 %v2825_v13, %v2821_v51 }
 0x60c   :  { %v1475_v14 = vpop.f32.mrb[16].mxu0 }
 0x60d   :  { %v2827_v15 = vpop.eup %2826  ;;  %v2661_v17 = vpop.f32.mrb[17].mxu0  ;;  %2665 = vmatmul.mubr.msk.f32.vlgmr.msra.gmra.mrb[16].mxu1 %vm244_vm3, %v1475_v14 }
 0x60e   :  { %2673 = vmatpush3.msra.mxu1 %v1630_v16  ;;  %v933_v18 = vsel %vm244_vm3, %v2827_v15, 0.0  ;;  %2674 = vmatprep.mubr.msk.f32.mxu1 %vm2896_vm2, %v2895_v26 }
 0x60f   :  { %934 = vadd.xlane.f32.xlu1 %v933_v18  ;;  %2682 = vmatprep.subr.mxu1 %v2895_v26 }
 0x611   :  { %v2829_v20 = vpop.eup %2828  ;;  %2675 = vmatmul.mubr.msk.f32.vlgmr.msra.gmra.mrb[18].mxu1 %vm244_vm3, %v952_v19 }
 0x612   :  { %v936_v21 = vsel %vm244_vm3, %v2829_v20, 0.0  ;;  %2683 = vmatpush3.msra.mxu1 %v44_v56  ;;  %2684 = vmatprep.mubr.msk.f32.mxu1 %vm2896_vm2, %v2895_v26 }
 0x613   :  { %937 = vadd.xlane.f32.xlu0 %v936_v21  ;;  %2692 = vmatprep.subr.mxu1 %v2895_v26  ;;  %v2468_v21 = vld [vmem:[%s3215_s3 + $0x3] ss:$0 sm:$0xff] }
 0x620   :  { %1553 = vrot.lane.b32.xlu1 %v2992_v32, %s2905_s18 }
 0x624   :  { %1851 = vrot.lane.b32.xlu1 %v2992_v32, %s2907_s20 }
 0x628   :  { %2001 = vrot.lane.b32.xlu1 %v2992_v32, %s2906_s19 }
 0x698   :  { %v929_v22 = vpop.xlane.xlu1 %928 }
 0x699   :  { %2830 = vrcp.f32 %v929_v22 }
 0x69c   :  { %v935_v23 = vpop.xlane.xlu1 %934 }
 0x69d   :  { %2832 = vrcp.f32 %v935_v23 }
 0x6a0   :  { %v1554_v27 = vpop.permute.xlu1 %1553  ;;  %v938_v34 = vpop.xlane.xlu0 %937 }
 0x6a1   :  { %2668 = vmatpush3.msra.mxu0 %v1554_v27  ;;  %2834 = vrcp.f32 %v938_v34  ;;  %v48_v27 = vld [vmem:[#allocation2 + $0x10] sm:$0xff]  ;;  %v52_v34 = vld [vmem:[#allocation2 + $0x68] sm:$0xff] }
 0x6a2   :  { %2677 = vmatprep.subr.mxu0 %v2895_v26 }
 0x6a3   :  { %v2831_v28 = vpop.eup %2830 }
 0x6a4   :  { %v951_v29 = vmul.f32 %v2831_v28, %v2823_v10  ;;  %v1852_v41 = vpop.permute.xlu1 %1851  ;;  %v49_v28 = vld [vmem:[#allocation2 + $0x28] sm:$0xff] }
 0x6a6   :  { %2670 = vmatmul.mubr.msk.f32.vlgmr.msra.gmra.mrb[18].mxu0 %vm244_vm3, %v951_v29  ;;  %v2761_v29 = vpack.c.bf16 %v49_v28, %v48_v27 }
 0x6a7   :  { %2678 = vmatpush3.msra.mxu0 %v3082_v30  ;;  %2679 = vmatprep.mubr.msk.f32.mxu0 %vm2896_vm2, %v2895_v26  ;;  %v2833_v43 = vpop.eup %2832 }
 0x6a8   :  { %2687 = vmatprep.subr.mxu0 %v2895_v26  ;;  %v953_v47 = vmul.f32 %v2833_v43, %v2827_v15  ;;  %v2002_v50 = vpop.permute.xlu1 %2001 }
 0x6ab   :  { %v2835_v49 = vpop.eup %2834 }
 0x6ac   :  { %v954_v51 = vmul.f32 %v2835_v49, %v2829_v20  ;;  %v58_v49 = vld [vmem:[#allocation2 + $0xf8] sm:$0xff] }
 0x6d4   :  { %v1249_v31 = vpop.f32.mrb[12].mxu1 }
 0x6d5   :  { %v1250_v32 = vadd.f32 %v1249_v31, %v1176_v5  ;;  %v2646_v33 = vpop.f32.mrb[13].mxu1  ;;  %v50_v31 = vld [vmem:[#allocation2 + $0x40] sm:$0xff] }
 0x6dc   :  { %v1398_v35 = vpop.f32.mrb[14].mxu1 }
 0x6dd   :  { %v1402_v36 = vadd.f32 %v1398_v35, %v1250_v32  ;;  %v2656_v37 = vpop.f32.mrb[15].mxu1  ;;  %v51_v32 = vld [vmem:[#allocation2 + $0x58] sm:$0xff]  ;;  %v53_v35 = vld [vmem:[#allocation2 + $0x80] sm:$0xff] }
 0x6de   :  { %v2765_v33 = vpack.c.bf16 %v51_v32, %v50_v31  ;;  %v2769_v37 = vpack.c.bf16 %v53_v35, %v52_v34 }
 0x6e0   :  { %v1548_v39 = vpop.f32.mrb[16].mxu1 }
 0x6e1   :  { %v1552_v30 = vadd.f32 %v1548_v39, %v1402_v36  ;;  %v2666_v40 = vpop.f32.mrb[17].mxu1  ;;  %v54_v36 = vld [vmem:[#allocation2 + $0x98] sm:$0xff] }
 0x6e2   :  { %v57_v40 = vld [vmem:[#allocation2 + $0xe0] sm:$0xff] }
 0x6e3   :  { %v2155_v42 = vadd.f32 %v2466_v38, %v1552_v30  ;;  %v56_v30 = vld [vmem:[#allocation2 + $0xc8] sm:$0xff] }
 0x6e4   :  { %v1701_v44 = vpop.f32.mrb[18].mxu1 }
 0x6e5   :  { %v2676_v45 = vpop.f32.mrb[19].mxu1  ;;  %2680 = vmatmul.mubr.msk.f32.vlgmr.msra.gmra.mrb[20].mxu0 %vm244_vm3, %v1701_v44  ;;  %v2157_v46 = vadd.f32 %v2155_v42, %v2962_v24 }
 0x6e6   :  { %2688 = vmatpush3.msra.mxu0 %v1852_v41  ;;  %2689 = vmatprep.mubr.msk.f32.mxu0 %vm2896_vm2, %v2895_v26  ;;  %v2777_v41 = vpack.c.bf16 %v57_v40, %v56_v30 }
 0x6e7   :  { %v2159_v48 = vsel %vm158_vm1, %v2157_v46, 0.0  ;;  %2697 = vmatprep.subr.mxu0 %v2895_v26 }
 0x6e8   :  { %2160 = vadd.xlane.f32.xlu1 %v2159_v48 }
 0x6e9   :  { %2690 = vmatmul.mubr.msk.f32.vlgmr.msra.gmra.mrb[22].mxu0 %vm244_vm3, %v953_v47 }
 0x6ea   :  { %2698 = vmatpush3.msra.mxu0 %v2002_v50  ;;  %2699 = vmatprep.mubr.msk.f32.mxu0 %vm2896_vm2, %v2895_v26  ;;  %v59_v50 = vld [vmem:[#allocation2 + $0x110] sm:$0xff] }
 0x6eb   :  { %2762 = vmatprep.subr.bf16.mxu0 %v2761_v29 }
 0x6ed   :  { %2700 = vmatmul.mubr.msk.f32.vlgmr.msra.gmra.mrb[24].mxu0 %vm244_vm3, %v954_v51  ;;  %v2781_v51 = vpack.c.bf16 %v59_v50, %v58_v49 }
 0x6ee   :  { %2764 = vmatpush3.bf16.msra.mxu0 %v2761_v29 }
 0x6ef   :  { %2766 = vmatprep.subr.bf16.mxu0 %v2765_v33 }
 0x6f2   :  { %2768 = vmatpush3.bf16.msra.mxu0 %v2765_v33 }
 0x775   :  { %v2161_v62 = vpop.xlane.xlu1 %2160 }
 0x776   :  { %v2166_v2 = vmul.f32 0.03125, %v2161_v62 }
 0x778   :  { %v2168_v6 = vsub.f32 %v2157_v46, %v2166_v2 }
 0x779   :  { %v1625_v24 = vpop.f32.mrb[18].mxu0 }
 0x77a   :  { %v2671_v52 = vpop.f32.mrb[19].mxu0  ;;  %2685 = vmatmul.mubr.msk.f32.vlgmr.msra.gmra.mrb[20].mxu1 %vm244_vm3, %v1625_v24  ;;  %v2170_v9 = vmul.f32 %v2168_v6, %v2168_v6  ;;  %v2469_v24 = vld [vmem:[%s3215_s3 + $0x4] ss:$0 sm:$0xff] }
 0x77b   :  { %2693 = vmatpush3.msra.mxu1 %v3107_v63  ;;  %2694 = vmatprep.mubr.msk.f32.mxu1 %vm2896_vm2, %v2895_v26 }
 0x77c   :  { %2702 = vmatprep.subr.mxu1 %v2895_v26  ;;  %v2172_v10 = vsel %vm158_vm1, %v2170_v9, 0.0 }
 0x7b8   :  { %v1774_v53 = vpop.f32.mrb[20].mxu0 }
 0x7b9   :  { %v2681_v54 = vpop.f32.mrb[21].mxu0 }
 0x7bc   :  { %v1923_v55 = vpop.f32.mrb[22].mxu0 }
 0x7bd   :  { %v2691_v56 = vpop.f32.mrb[23].mxu0  ;;  %2695 = vmatmul.mubr.msk.f32.vlgmr.msra.gmra.mrb[22].mxu1 %vm244_vm3, %v1923_v55 }
 0x7be   :  { %2703 = vmatpush3.msra.mxu1 %v3115_v8  ;;  %2704 = vmatprep.mubr.msk.f32.mxu1 %vm2896_vm2, %v2895_v26 }
 0x7bf   :  { %2770 = vmatprep.subr.bf16.mxu1 %v2769_v37 }
 0x7c0   :  { %v2073_v57 = vpop.f32.mrb[24].mxu0 }
 0x7c1   :  { %v2701_v58 = vpop.f32.mrb[25].mxu0  ;;  %2705 = vmatmul.mubr.msk.f32.vlgmr.msra.gmra.mrb[24].mxu1 %vm244_vm3, %v2073_v57 }
 0x7c2   :  { %2772 = vmatpush3.bf16.msra.mxu1 %v2769_v37  ;;  %v2472_v58 = vld [vmem:[%s3215_s3 + $0x5] ss:$0 sm:$0xff] }
 0x84d   :  { %v1847_v59 = vpop.f32.mrb[20].mxu1 }
 0x84e   :  { %v1848_v60 = vadd.f32 %v1847_v59, %v1774_v53  ;;  %v2686_v61 = vpop.f32.mrb[21].mxu1 }
 0x890   :  { %v1996_v63 = vpop.f32.mrb[22].mxu1 }
 0x891   :  { %v2000_v0 = vadd.f32 %v1996_v63, %v1848_v60  ;;  %v2696_v1 = vpop.f32.mrb[23].mxu1 }
 0x894   :  { %v2146_v3 = vpop.f32.mrb[24].mxu1 }
 0x895   :  { %v2150_v4 = vadd.f32 %v2146_v3, %v2000_v0  ;;  %v2706_v5 = vpop.f32.mrb[25].mxu1 }
 0x897   :  { %v2156_v7 = vadd.f32 %v2466_v38, %v2150_v4  ;;  %v55_v38 = vld [vmem:[#allocation2 + $0xb0] sm:$0xff] }
 0x898   :  { %v2773_v39 = vpack.c.bf16 %v55_v38, %v54_v36 }
 0x899   :  { %v2158_v8 = vadd.f32 %v2156_v7, %v2964_v25  ;;  %v2467_v25 = vld [vmem:[%s3215_s3 + $0x2] ss:$0 sm:$0xff] }
 0x89a   :  { %2774 = vmatprep.subr.bf16.mxu1 %v2773_v39 }
 0x89b   :  { %v2162_v26 = vsel %vm158_vm1, %v2158_v8, 0.0  ;;  %2776 = vmatpush3.bf16.msra.mxu1 %v2773_v39 }
 0x89c   :  { %2163 = vadd.xlane.f32.xlu0 %v2162_v26  ;;  %2778 = vmatprep.subr.bf16.mxu1 %v2777_v41 }
 0x89f   :  { %2780 = vmatpush3.bf16.msra.mxu1 %v2777_v41 }
 0x8a0   :  { %2173 = vadd.xlane.f32.xlu0 %v2172_v10  ;;  %2782 = vmatprep.subr.bf16.mxu1 %v2781_v51 }
 0x8a3   :  { %2784 = vmatpush3.bf16.msra.mxu1 %v2781_v51 }
 0x929   :  { %v2164_v11 = vpop.xlane.xlu0 %2163 }
 0x92a   :  { %v2167_v12 = vmul.f32 0.03125, %v2164_v11 }
 0x92c   :  { %v2169_v13 = vsub.f32 %v2158_v8, %v2167_v12 }
 0x92d   :  { %v2174_v14 = vpop.xlane.xlu0 %2173 }
 0x92e   :  { %v2178_v15 = vmul.f32 0.03125, %v2174_v14  ;;  %v2171_v16 = vmul.f32 %v2169_v13, %v2169_v13 }
 0x930   :  { %v2180_v17 = vadd.f32 1e-05, %v2178_v15  ;;  %v2175_v18 = vsel %vm158_vm1, %v2171_v16, 0.0 }
 0x931   :  { %2176 = vadd.xlane.f32.xlu0 %v2175_v18 }
 0x932   :  { %2836 = vrsqrt.f32 %v2180_v17 }
 0x93c   :  { %v2837_v19 = vpop.eup %2836 }
 0x93d   :  { %v2184_v20 = vmul.f32 %v2837_v19, %v2168_v6  ;;  %v2475_v19 = vld [vmem:[%s3215_s3 + $0x6] ss:$0 sm:$0xff] }
 0x93f   :  { %v2190_v22 = vmul.f32 %v2467_v25, %v2184_v20  ;;  %v2476_v20 = vld [vmem:[%s3215_s3 + $0x7] ss:$0 sm:$0xff] }
 0x941   :  { %v2196_v23 = vadd.f32 %v2468_v21, %v2190_v22 }
 0x943   :  { %2715 = vmatprep.mubr.msk.f32.mxu0 %vm158_vm1, %v2196_v23 }
 0x9be   :  { %v2177_v42 = vpop.xlane.xlu0 %2176 }
 0x9bf   :  { %v2179_v43 = vmul.f32 0.03125, %v2177_v42 }
 0x9c1   :  { %v2181_v44 = vadd.f32 1e-05, %v2179_v43 }
 0x9c3   :  { %2838 = vrsqrt.f32 %v2181_v44 }
 0x9cd   :  { %v2839_v45 = vpop.eup %2838 }
 0x9ce   :  { %v2185_v46 = vmul.f32 %v2839_v45, %v2169_v13 }
 0x9d0   :  { %v2191_v47 = vmul.f32 %v2467_v25, %v2185_v46 }
 0x9d2   :  { %v2197_v48 = vadd.f32 %v2468_v21, %v2191_v47 }
 0x9d4   :  { %2716 = vmatmul.mubr.msk.f32.vlgmr.msra.gmra.mrb[26].mxu0 %vm158_vm1, %v2197_v48 }
 0xaa7   :  { %v2717_v52 = vpop.f32.mrb[26].mxu0 }
 0xaa8   :  { %v2280_v53 = vadd.f32 %v2717_v52, %v2469_v24  ;;  %v2274_v54 = vpop.f32.mrb[27].mxu0 }
 0xaa9   :  { %v2275_v55 = vadd.f32 %v2469_v24, %v2274_v54 }
 0xaaa   :  { %v2284_v57 = vmax.f32 %v2280_v53, 0.0 }
 0xaab   :  { %v2283_v56 = vmax.f32 %v2275_v55, 0.0 }
 0xaad   :  { %2734 = vmatprep.mubr.msk.f32.mxu1 %vm72_vm0, %v2283_v56 }
 0xaae   :  { %2735 = vmatmul.mubr.msk.f32.vlgmr.msra.gmra.mrb[26].mxu1 %vm72_vm0, %v2284_v57 }
 0xb81   :  { %v2736_v59 = vpop.f32.mrb[26].mxu1 }
 0xb82   :  { %v2361_v60 = vpop.f32.mrb[27].mxu1  ;;  %v2367_v61 = vadd.f32 %v2736_v59, %v2472_v58 }
 0xb83   :  { %v2362_v62 = vadd.f32 %v2472_v58, %v2361_v60 }
 0xb84   :  { %v2371_v1 = vadd.f32 %v2367_v61, %v2197_v48 }
 0xb85   :  { %v2370_v63 = vadd.f32 %v2362_v62, %v2196_v23 }
 0xb86   :  { %v2375_v2 = vsel %vm158_vm1, %v2371_v1, 0.0 }
 0xb87   :  { %v2372_v0 = vsel %vm158_vm1, %v2370_v63, 0.0 }
 0xb88   :  { %2373 = vadd.xlane.f32.xlu0 %v2372_v0 }
 0xb8c   :  { %2376 = vadd.xlane.f32.xlu0 %v2375_v2 }
 0xc15   :  { %v2374_v3 = vpop.xlane.xlu0 %2373 }
 0xc16   :  { %v2378_v4 = vmul.f32 0.03125, %v2374_v3 }
 0xc18   :  { %v2380_v5 = vsub.f32 %v2370_v63, %v2378_v4 }
 0xc19   :  { %v2377_v6 = vpop.xlane.xlu0 %2376 }
 0xc1a   :  { %v2379_v7 = vmul.f32 0.03125, %v2377_v6  ;;  %v2382_v8 = vmul.f32 %v2380_v5, %v2380_v5 }
 0xc1c   :  { %v2381_v26 = vsub.f32 %v2371_v1, %v2379_v7  ;;  %v2384_v9 = vsel %vm158_vm1, %v2382_v8, 0.0 }
 0xc1d   :  { %2385 = vadd.xlane.f32.xlu0 %v2384_v9 }
 0xc1e   :  { %v2383_v10 = vmul.f32 %v2381_v26, %v2381_v26 }
 0xc20   :  { %v2387_v11 = vsel %vm158_vm1, %v2383_v10, 0.0 }
 0xc21   :  { %2388 = vadd.xlane.f32.xlu0 %v2387_v11 }
 0xcaa   :  { %v2386_v12 = vpop.xlane.xlu0 %2385 }
 0xcab   :  { %v2390_v13 = vmul.f32 0.03125, %v2386_v12 }
 0xcad   :  { %v2392_v14 = vadd.f32 1e-05, %v2390_v13 }
 0xcae   :  { %v2389_v15 = vpop.xlane.xlu0 %2388 }
 0xcaf   :  { %2840 = vrsqrt.f32 %v2392_v14  ;;  %v2391_v16 = vmul.f32 0.03125, %v2389_v15 }
 0xcb1   :  { %v2393_v17 = vadd.f32 1e-05, %v2391_v16 }
 0xcb3   :  { %2842 = vrsqrt.f32 %v2393_v17 }
 0xcb9   :  { %v2841_v18 = vpop.eup %2840 }
 0xcba   :  { %v2396_v25 = vmul.f32 %v2841_v18, %v2380_v5 }
 0xcbc   :  { %v2402_v21 = vmul.f32 %v2475_v19, %v2396_v25 }
 0xcbd   :  { %v2843_v22 = vpop.eup %2842 }
 0xcbe   :  { %v2397_v23 = vmul.f32 %v2843_v22, %v2381_v26  ;;  %v2408_v27 = vadd.f32 %v2476_v20, %v2402_v21 }
 0xcc0   :  { %v2403_v28 = vmul.f32 %v2475_v19, %v2397_v23  ;;  %2410 = vst.msk [vmem:[#allocation5] sm:$0xff] %vm158_vm1, %v2408_v27 }
 0xcc2   :  { %v2409_v29 = vadd.f32 %v2476_v20, %v2403_v28 }
 0xcc4   :  { %2411 = vst.msk [vmem:[#allocation5 + $0x8] sm:$0xff] %vm158_vm1, %v2409_v29 }
 0xcc5   :  { %2877 = shalt.err (!%p2874_p12)
}
 0xcc6   :  { %s2878_s10 = scalar_lea.hbm %s3216_s4, 256 }
 0xcc7   :  { %p2879_p13 = scmp.ne.s32.totalorder %s3216_s4, %s2878_s10  ;;  %p2882_p0 = scmp.lt.u32.totalorder %s2878_s10, %s3216_s4 }
 0xcc9   :  { %p2884_p1 = pnand %p2882_p0, %p2879_p13 }
 0xccb   :  { %2887 = shalt.err (!%p2884_p1)
}
 0xccc   :  { %s2909_s15 = smov 128   ;;  %s2910_s16 = smov 8  }
 0xccd   :  { %2423 = dma.vmem_to_hbm [thread:$0]  %s2418_s9, 256, %s3216_s4, [#allocation4], %s2909_s15, %s2909_s15, %s2910_s16  }
 0xcce   :  { %2890 = dma.done.wait [#allocation4], 256  }
 0xccf   :  { %2891 = vsyncadd [#allocation4], 4294967040 }
 0xcd0   :  { %2427 = vsyncpa [#allocation3], 1 }
 0xcd1   :  { %2428 = vsyncpa [#allocation4], 1 }

</bundles_post_ra>
